<compile_context>
chip_gen: v5e
topology: v5e:2x2
jax: 0.10.0
libtpu: 0.0.40
codegen_flags: <defaults>
</compile_context>

<pallas_src>
import functools

import jax
import jax.numpy as jnp
from jax.experimental import pallas as pl
from jax.experimental.pallas import tpu as pltpu


def _channel_attention_kernel(x_ref, w1_ref, b1_ref, w2_ref, b2_ref, out_ref,
                              sum_acc, max_acc, *, hw_true, thw, needs_mask):
    # x_ref:   (1, C, THW) spatial tile of one batch element
    # w1_ref:  (C, Ch)     fc1 weight, pre-transposed   (Ch = C // ratio)
    # b1_ref:  (1, Ch)     fc1 bias
    # w2_ref:  (Ch, C)     fc2 weight, pre-transposed
    # b2_ref:  (1, C)      fc2 bias
    # out_ref: (1, 1, C)   sigmoid(fc2(relu(fc1(avg))) + fc2(relu(fc1(max))))
    # sum_acc: (C, 1) f32  running spatial sum   (scratch)
    # max_acc: (C, 1) f32  running spatial max   (scratch)
    k = pl.program_id(1)

    @pl.when(k == 0)
    def _init():
        sum_acc[...] = jnp.zeros_like(sum_acc)
        max_acc[...] = jnp.full_like(max_acc, -jnp.inf)

    x = x_ref[0]  # (C, THW), kept in the input dtype

    if needs_mask:
        pos = k * thw + jax.lax.broadcasted_iota(jnp.int32, x.shape, 1)
        valid = pos < hw_true
        x_sum = jnp.where(valid, x, 0.0)
        x_max = jnp.where(valid, x, -jnp.inf)
    else:
        x_sum = x
        x_max = x

    # Per-tile partial reductions, accumulated in f32.
    sum_acc[...] += jnp.sum(x_sum, axis=-1, keepdims=True, dtype=jnp.float32)
    max_acc[...] = jnp.maximum(
        max_acc[...],
        jnp.max(x_max, axis=-1, keepdims=True).astype(jnp.float32))

    @pl.when(k == pl.num_programs(1) - 1)
    def _epilogue():
        inv_hw = 1.0 / float(hw_true)
        # Fuse avg + max into one (2, C) MLP pass (single fc1/ReLU/fc2).
        stacked = jnp.concatenate([sum_acc[...] * inv_hw, max_acc[...]],
                                  axis=1)        # (C, 2)
        stacked = stacked.T                       # (2, C)
        h = jnp.dot(stacked, w1_ref[...],
                    preferred_element_type=jnp.float32) + b1_ref[...]   # (2, Ch)
        h = jnp.maximum(h, 0.0)
        o = jnp.dot(h, w2_ref[...],
                    preferred_element_type=jnp.float32) + b2_ref[...]   # (2, C)
        gate = jax.nn.sigmoid(o[0:1, :] + o[1:2, :])                    # (1, C)
        out_ref[0] = gate.astype(out_ref.dtype)


def channel_attention(x_nchw, w1, b1, w2, b2, *, tile_bytes=8 << 20):
    """x_nchw: (B, C, H, W).  Returns (B, C, 1, 1) float32 (same as PyTorch)."""
    B, C, H, W = x_nchw.shape
    Ch = w1.shape[0]
    HW = H * W
    itemsize = jnp.dtype(x_nchw.dtype).itemsize

    # Spatial tile on the lane axis: multiple of 128, sized so one (C, THW)
    # block is ~tile_bytes.  Double-buffered that stays well under scoped VMEM
    # on v5e/v6e (128 MiB physical) and v7x (64 MiB physical).
    thw = max(128, (tile_bytes // (C * itemsize)) // 128 * 128)
    hw_min_pad = pl.cdiv(HW, 128) * 128
    thw = min(thw, hw_min_pad)
    hw_pad = pl.cdiv(HW, thw) * thw
    num_k = hw_pad // thw
    needs_mask = hw_pad != HW

    x_flat = x_nchw.reshape(B, C, HW)
    if needs_mask:
        # Zero-pad; the kernel masks padded lanes (sum: 0, max: -inf).
        x_flat = jnp.pad(x_flat, ((0, 0), (0, 0), (0, hw_pad - HW)))

    # Pre-transpose weights so the kernel does plain row-major matmuls.
    w1t = jnp.asarray(w1, jnp.float32).T            # (C, Ch)
    w2t = jnp.asarray(w2, jnp.float32).T            # (Ch, C)
    b1_2d = jnp.asarray(b1, jnp.float32).reshape(1, Ch)
    b2_2d = jnp.asarray(b2, jnp.float32).reshape(1, C)

    kernel = functools.partial(_channel_attention_kernel,
                               hw_true=HW, thw=thw, needs_mask=needs_mask)

    cost = pl.CostEstimate(
        flops=2 * B * C * hw_pad + 8 * B * C * Ch,
        transcendentals=B * C,
        bytes_accessed=B * C * hw_pad * itemsize
        + (2 * C * Ch + C + Ch) * 4 + B * C * 4,
    )

    out = pl.pallas_call(
        kernel,
        out_shape=jax.ShapeDtypeStruct((B, 1, C), jnp.float32),
        grid_spec=pltpu.PrefetchScalarGridSpec(
            num_scalar_prefetch=0,
            grid=(B, num_k),
            in_specs=[
                pl.BlockSpec((1, C, thw), lambda b, k: (b, 0, k)),   # x tile
                pl.BlockSpec((C, Ch), lambda b, k: (0, 0)),          # w1^T
                pl.BlockSpec((1, Ch), lambda b, k: (0, 0)),          # b1
                pl.BlockSpec((Ch, C), lambda b, k: (0, 0)),          # w2^T
                pl.BlockSpec((1, C), lambda b, k: (0, 0)),           # b2
            ],
            out_specs=pl.BlockSpec((1, 1, C), lambda b, k: (b, 0, 0)),
            scratch_shapes=[
                pltpu.VMEM((C, 1), jnp.float32),   # running sum
                pltpu.VMEM((C, 1), jnp.float32),   # running max
            ],
        ),
        compiler_params=pltpu.CompilerParams(
            dimension_semantics=("parallel", "arbitrary"),
            vmem_limit_bytes=48 << 20,
        ),
        cost_estimate=cost,
    )(x_flat, w1t, b1_2d, w2t, b2_2d)

    return out.reshape(B, C, 1, 1)


def _reference(x, w1, b1, w2, b2):
    avg = jnp.mean(x, axis=(2, 3))
    mx = jnp.max(x, axis=(2, 3))

    def mlp(v):
        h = jnp.maximum(v @ w1.T + b1, 0.0)
        return h @ w2.T + b2

    B, C = avg.shape
    return jax.nn.sigmoid(mlp(avg) + mlp(mx)).reshape(B, C, 1, 1)


if __name__ == "__main__":
    B, C, ratio = 2, 16, 8
    Ch = C // ratio

    key = jax.random.PRNGKey(0)
    kx, kw1, kb1, kw2, kb2, kx2 = jax.random.split(key, 6)

    # Synthetic params (nn.Conv2d(C, C//r, 1) weights squeezed to 2-D).
    w1 = jax.random.normal(kw1, (Ch, C), dtype=jnp.float32) * 0.1   # fc1.weight
    b1 = jax.random.normal(kb1, (Ch,), dtype=jnp.float32) * 0.1     # fc1.bias
    w2 = jax.random.normal(kw2, (C, Ch), dtype=jnp.float32) * 0.1   # fc2.weight
    b2 = jax.random.normal(kb2, (C,), dtype=jnp.float32) * 0.1      # fc2.bias

    # Case 1: H*W already a multiple of 128 (no padding path).
    x = jax.random.normal(kx, (B, C, 16, 16), dtype=jnp.float32)
    out = jax.block_until_ready(channel_attention(x, w1, b1, w2, b2))
    ref = _reference(x, w1, b1, w2, b2)
    assert out.shape == (B, C, 1, 1)
    assert jnp.allclose(out, ref, atol=1e-5, rtol=1e-5)

    # Case 2: H*W not a multiple of 128 (exercises the in-kernel padding mask).
    x2 = jax.random.normal(kx2, (B, C, 10, 10), dtype=jnp.float32)
    out2 = jax.block_until_ready(channel_attention(x2, w1, b1, w2, b2))
    ref2 = _reference(x2, w1, b1, w2, b2)
    assert out2.shape == (B, C, 1, 1)
    assert jnp.allclose(out2, ref2, atol=1e-5, rtol=1e-5)

    print("KERNEL_OK")
</pallas_src>

<mosaic_0001>
module attributes {stable_mosaic.version = 11 : i64} {
  func.func @_channel_attention_kernel(%arg0: i32, %arg1: i32, %arg2: memref<1x16x256xf32, #tpu.memory_space<vmem>>, %arg3: memref<16x2xf32, #tpu.memory_space<vmem>>, %arg4: memref<1x2xf32, #tpu.memory_space<vmem>>, %arg5: memref<2x16xf32, #tpu.memory_space<vmem>>, %arg6: memref<1x16xf32, #tpu.memory_space<vmem>>, %arg7: memref<1x1x16xf32, #tpu.memory_space<vmem>>, %arg8: memref<16x1xf32, #tpu.memory_space<vmem>>, %arg9: memref<16x1xf32, #tpu.memory_space<vmem>>) attributes {dimension_semantics = [#tpu.dimension_semantics<parallel>, #tpu.dimension_semantics<arbitrary>], iteration_bounds = array<i64: 2, 1>, scalar_prefetch = 0 : i64, scratch_operands = 2 : i64, tpu.core_type = #tpu.core_type<tc>, window_params = [{transform_indices = @transform_0, window_bounds = array<i64: 1, 16, 256>}, {pipeline_mode = #tpu.pipeline_mode<synchronous>, transform_indices = @transform_1, window_bounds = array<i64: 16, 2>}, {pipeline_mode = #tpu.pipeline_mode<synchronous>, transform_indices = @transform_2, window_bounds = array<i64: 1, 2>}, {pipeline_mode = #tpu.pipeline_mode<synchronous>, transform_indices = @transform_3, window_bounds = array<i64: 2, 16>}, {pipeline_mode = #tpu.pipeline_mode<synchronous>, transform_indices = @transform_4, window_bounds = array<i64: 1, 16>}, {transform_indices = @transform_5, window_bounds = array<i64: 1, 1, 16>}]} {
    %c0_i32 = arith.constant 0 : i32
    %0 = arith.cmpi eq, %arg1, %c0_i32 : i32
    %1 = arith.extui %0 : i1 to i32
    %c0_i32_0 = arith.constant 0 : i32
    %2 = arith.cmpi ne, %1, %c0_i32_0 : i32
    scf.if %2 {
      %cst_14 = arith.constant 0.000000e+00 : f32
      %18 = vector.broadcast %cst_14 : f32 to vector<16x1xf32>
      %c0_15 = arith.constant 0 : index
      %c0_16 = arith.constant 0 : index
      %19 = vector.load %arg8[%c0_15, %c0_16] : memref<16x1xf32, #tpu.memory_space<vmem>>, vector<16x1xf32>
      tpu.vector_store %arg8[%c0_15, %c0_16], %18 {strides = array<i32>} : memref<16x1xf32, #tpu.memory_space<vmem>>, vector<16x1xf32>,
      %cst_17 = arith.constant 0xFF800000 : f32
      %20 = vector.broadcast %cst_17 : f32 to vector<16x1xf32>
      %c0_18 = arith.constant 0 : index
      %c0_19 = arith.constant 0 : index
      %21 = vector.load %arg9[%c0_18, %c0_19] : memref<16x1xf32, #tpu.memory_space<vmem>>, vector<16x1xf32>
      tpu.vector_store %arg9[%c0_18, %c0_19], %20 {strides = array<i32>} : memref<16x1xf32, #tpu.memory_space<vmem>>, vector<16x1xf32>,
    } else {
    }
    %c0 = arith.constant 0 : index
    %c0_1 = arith.constant 0 : index
    %c0_2 = arith.constant 0 : index
    %3 = vector.load %arg2[%c0, %c0_1, %c0_2] : memref<1x16x256xf32, #tpu.memory_space<vmem>>, vector<1x16x256xf32>
    %4 = vector.shape_cast %3 : vector<1x16x256xf32> to vector<16x256xf32>
    %c0_3 = arith.constant 0 : index
    %c0_4 = arith.constant 0 : index
    %5 = vector.load %arg8[%c0_3, %c0_4] : memref<16x1xf32, #tpu.memory_space<vmem>>, vector<16x1xf32>
    %cst = arith.constant dense<0.000000e+00> : vector<16xf32>
    %6 = vector.multi_reduction <add>, %4, %cst [1] : vector<16x256xf32> to vector<16xf32>
    %7 = vector.shape_cast %6 : vector<16xf32> to vector<16x1xf32>
    %8 = arith.addf %5, %7 : vector<16x1xf32>
    %c0_5 = arith.constant 0 : index
    %c0_6 = arith.constant 0 : index
    %9 = vector.load %arg8[%c0_5, %c0_6] : memref<16x1xf32, #tpu.memory_space<vmem>>, vector<16x1xf32>
    tpu.vector_store %arg8[%c0_5, %c0_6], %8 {strides = array<i32>} : memref<16x1xf32, #tpu.memory_space<vmem>>, vector<16x1xf32>,
    %c0_7 = arith.constant 0 : index
    %c0_8 = arith.constant 0 : index
    %10 = vector.load %arg9[%c0_7, %c0_8] : memref<16x1xf32, #tpu.memory_space<vmem>>, vector<16x1xf32>
    %cst_9 = arith.constant dense<0xFF800000> : vector<16xf32>
    %11 = vector.multi_reduction <maximumf>, %4, %cst_9 [1] : vector<16x256xf32> to vector<16xf32>
    %12 = vector.shape_cast %11 : vector<16xf32> to vector<16x1xf32>
    %13 = arith.maximumf %10, %12 : vector<16x1xf32>
    %c0_10 = arith.constant 0 : index
    %c0_11 = arith.constant 0 : index
    %14 = vector.load %arg9[%c0_10, %c0_11] : memref<16x1xf32, #tpu.memory_space<vmem>>, vector<16x1xf32>
    tpu.vector_store %arg9[%c0_10, %c0_11], %13 {strides = array<i32>} : memref<16x1xf32, #tpu.memory_space<vmem>>, vector<16x1xf32>,
    %c0_i32_12 = arith.constant 0 : i32
    %15 = arith.cmpi eq, %arg1, %c0_i32_12 : i32
    %16 = arith.extui %15 : i1 to i32
    %c0_i32_13 = arith.constant 0 : i32
    %17 = arith.cmpi ne, %16, %c0_i32_13 : i32
    scf.if %17 {
      %c0_14 = arith.constant 0 : index
      %c0_15 = arith.constant 0 : index
      %18 = vector.load %arg8[%c0_14, %c0_15] : memref<16x1xf32, #tpu.memory_space<vmem>>, vector<16x1xf32>
      %cst_16 = arith.constant 3.906250e-03 : f32
      %19 = vector.broadcast %cst_16 : f32 to vector<16x1xf32>
      %20 = arith.mulf %18, %19 : vector<16x1xf32>
      %c0_17 = arith.constant 0 : index
      %c0_18 = arith.constant 0 : index
      %21 = vector.load %arg9[%c0_17, %c0_18] : memref<16x1xf32, #tpu.memory_space<vmem>>, vector<16x1xf32>
      %22 = tpu.concatenate %20, %21 in 1 : vector<16x1xf32>, vector<16x1xf32> -> vector<16x2xf32>
      %23 = tpu.transpose %22, [1, 0] : vector<16x2xf32> -> vector<2x16xf32>
      %c0_19 = arith.constant 0 : index
      %c0_20 = arith.constant 0 : index
      %24 = vector.load %arg3[%c0_19, %c0_20] : memref<16x2xf32, #tpu.memory_space<vmem>>, vector<16x2xf32>
      %cst_21 = arith.constant dense<0.000000e+00> : vector<2x2xf32>
      %25 = tpu.matmul %23, %24, %cst_21 {dimension_numbers = #tpu.dot_dimension_numbers<[1], [0], [0], [1], [0, 0, 1, 1], [], []>} : vector<2x16xf32>, vector<16x2xf32>, vector<2x2xf32> -> vector<2x2xf32>
      %c0_22 = arith.constant 0 : index
      %c0_23 = arith.constant 0 : index
      %26 = vector.load %arg4[%c0_22, %c0_23] : memref<1x2xf32, #tpu.memory_space<vmem>>, vector<1x2xf32>
      %27 = vector.broadcast %26 : vector<1x2xf32> to vector<2x2xf32>
      %28 = arith.addf %25, %27 : vector<2x2xf32>
      %cst_24 = arith.constant 0.000000e+00 : f32
      %29 = vector.broadcast %cst_24 : f32 to vector<2x2xf32>
      %30 = arith.maximumf %28, %29 : vector<2x2xf32>
      %c0_25 = arith.constant 0 : index
      %c0_26 = arith.constant 0 : index
      %31 = vector.load %arg5[%c0_25, %c0_26] : memref<2x16xf32, #tpu.memory_space<vmem>>, vector<2x16xf32>
      %cst_27 = arith.constant dense<0.000000e+00> : vector<2x16xf32>
      %32 = tpu.matmul %30, %31, %cst_27 {dimension_numbers = #tpu.dot_dimension_numbers<[1], [0], [0], [1], [0, 0, 1, 1], [], []>} : vector<2x2xf32>, vector<2x16xf32>, vector<2x16xf32> -> vector<2x16xf32>
      %c0_28 = arith.constant 0 : index
      %c0_29 = arith.constant 0 : index
      %33 = vector.load %arg6[%c0_28, %c0_29] : memref<1x16xf32, #tpu.memory_space<vmem>>, vector<1x16xf32>
      %34 = vector.broadcast %33 : vector<1x16xf32> to vector<2x16xf32>
      %35 = arith.addf %32, %34 : vector<2x16xf32>
      %36 = vector.extract_strided_slice %35 {offsets = [0, 0], sizes = [1, 16], strides = [1, 1]} : vector<2x16xf32> to vector<1x16xf32>
      %37 = vector.extract_strided_slice %35 {offsets = [1, 0], sizes = [1, 16], strides = [1, 1]} : vector<2x16xf32> to vector<1x16xf32>
      %38 = arith.addf %36, %37 : vector<1x16xf32>
      %39 = arith.negf %38 : vector<1x16xf32>
      %40 = math.exp %39 : vector<1x16xf32>
      %cst_30 = arith.constant 1.000000e+00 : f32
      %41 = vector.broadcast %cst_30 : f32 to vector<1x16xf32>
      %42 = arith.addf %41, %40 : vector<1x16xf32>
      %43 = arith.divf %41, %42 : vector<1x16xf32>
      %c0_31 = arith.constant 0 : index
      %c0_32 = arith.constant 0 : index
      %c0_33 = arith.constant 0 : index
      %44 = vector.load %arg7[%c0_31, %c0_32, %c0_33] : memref<1x1x16xf32, #tpu.memory_space<vmem>>, vector<1x1x16xf32>
      %45 = vector.shape_cast %44 : vector<1x1x16xf32> to vector<1x16xf32>
      %46 = vector.shape_cast %43 : vector<1x16xf32> to vector<1x1x16xf32>
      tpu.vector_store %arg7[%c0_31, %c0_32, %c0_33], %46 {strides = array<i32>} : memref<1x1x16xf32, #tpu.memory_space<vmem>>, vector<1x1x16xf32>,
    } else {
    }
    return
  }
  func.func @transform_0(%arg0: i32, %arg1: i32) -> (i32, i32, i32) {
    %c0_i32 = arith.constant 0 : i32
    %c0_i32_0 = arith.constant 0 : i32
    return %arg0, %c0_i32, %arg1 : i32, i32, i32
  }
  func.func @transform_1(%arg0: i32, %arg1: i32) -> (i32, i32) {
    %c0_i32 = arith.constant 0 : i32
    %c0_i32_0 = arith.constant 0 : i32
    %c0_i32_1 = arith.constant 0 : i32
    return %c0_i32, %c0_i32_0 : i32, i32
  }
  func.func @transform_2(%arg0: i32, %arg1: i32) -> (i32, i32) {
    %c0_i32 = arith.constant 0 : i32
    %c0_i32_0 = arith.constant 0 : i32
    %c0_i32_1 = arith.constant 0 : i32
    return %c0_i32, %c0_i32_0 : i32, i32
  }
  func.func @transform_3(%arg0: i32, %arg1: i32) -> (i32, i32) {
    %c0_i32 = arith.constant 0 : i32
    %c0_i32_0 = arith.constant 0 : i32
    %c0_i32_1 = arith.constant 0 : i32
    return %c0_i32, %c0_i32_0 : i32, i32
  }
  func.func @transform_4(%arg0: i32, %arg1: i32) -> (i32, i32) {
    %c0_i32 = arith.constant 0 : i32
    %c0_i32_0 = arith.constant 0 : i32
    %c0_i32_1 = arith.constant 0 : i32
    return %c0_i32, %c0_i32_0 : i32, i32
  }
  func.func @transform_5(%arg0: i32, %arg1: i32) -> (i32, i32, i32) {
    %c0_i32 = arith.constant 0 : i32
    %c0_i32_0 = arith.constant 0 : i32
    %c0_i32_1 = arith.constant 0 : i32
    return %arg0, %c0_i32, %c0_i32_0 : i32, i32, i32
  }
}

</mosaic_0001>

<bundles_post_ra>
// kernel: tpu_custom_call.1
= control target key start
LH: loop header
LB: loop body
LE: loop exit
PB: predicated region body
PF: predicated region fallthrough
CT: control target
= control target key end

     0   :  { %10 = vsyncpa [#allocation5], 0  ;;  %s913_s0 = inlined_call_operand.hbm [shape: f32[2,16,256], index: 0, kind: input, shape index: {}]   ;;  %s914_s1 = inlined_call_operand.vmem [shape: f32[16,2], index: 1, kind: input, shape index: {}]   ;;  %s915_s2 = inlined_call_operand.vmem [shape: f32[1,2], index: 2, kind: input, shape index: {}]   ;;  %s916_s3 = inlined_call_operand.vmem [shape: f32[2,16], index: 3, kind: input, shape index: {}]   ;;  %s917_s4 = inlined_call_operand.vmem [shape: f32[1,16], index: 4, kind: input, shape index: {}]   ;;  %s918_s5 = inlined_call_operand.hbm [shape: f32[2,1,16], index: 5, kind: output, shape index: {}]  }
   0x1   :  { %12 = vsyncpa [#allocation5 + $0x1], 0 }
   0x2   :  { %13 = vsyncpa [#allocation6], 0 }
   0x3   :  { %15 = vsyncpa [#allocation6 + $0x1], 0  ;;  %s767_s18 = smov 0   ;;  %s769_s19 = smov 0  }
   0x4   :  { %s771_s20 = smov 0   ;;  %s773_s21 = smov 0  }
   0x5   :  { %s775_s22 = smov 0   ;;  %s777_s23 = smov 0  }
   0x6 LB: > { %s529_s24 = sadd.s32 4294967295, %s730_s23   ;;  %s530_s25 = sadd.s32 4294967294, %s730_s23   ;;  %s730_s23 = sphi %s777_s23, %s21_s23   ;;  %s726_s22 = sphi %s775_s22, %s927_s22   ;;  %s722_s21 = sphi %s773_s21, %s926_s21   ;;  %s718_s20 = sphi %s771_s20, %s925_s20   ;;  %s714_s19 = sphi %s769_s19, %s924_s19   ;;  %s710_s18 = sphi %s767_s18, %s923_s18  }
   0x7   : > { %s33_s26 = sadd.s32 1, %s726_s22  ;;  %s42_s27 = sadd.s32 1, %s718_s20 }
   0x8   : > { %p35_p0 = scmp.ge.s32.totalorder %s33_s26, 2  ;;  %p49_p1 = scmp.ne.s32.totalorder %s718_s20, %s714_s19 }
   0x9   : > { %p50_p2 = scmp.eq.s32.totalorder %s730_s23, 0  ;;  %p55_p3 = scmp.ne.s32.totalorder %s714_s19, %s710_s18 }
   0xa   : > { %s929_s26 = smov (%p35_p0, %s33_s26), 0  ;;  %p56_p5 = scmp.eq.s32.totalorder %s529_s24, 0 }
   0xb   : > { %p808_p4 = por %p50_p2, %p49_p1  ;;  %s37_s29 = ssub.s32 %s726_s22, %s929_s26 }
   0xc   : > { %p163_p6 = scmp.eq.s32.totalorder %s529_s24, 1  ;;  %p40_p7 = scmp.eq.s32.totalorder %s37_s29, 0 }
   0xd   : > { %p814_p8 = por %p56_p5, %p55_p3  ;;  %p169_p10 = scmp.eq.s32.totalorder %s530_s25, 1 }
   0xe   : > { %p818_p9 = por %p163_p6, %p49_p1  ;;  %p532_p12 = scmp.ge.s32.totalorder %s730_s23, 2 }
   0xf   : > { %s823_s7 = scalar_select %p40_p7, %s718_s20, %s42_s27  }
  0x10   : > { %p825_p11 = por %p169_p10, %p55_p3  ;;  %p557_p13 = scmp.lt.s32.totalorder %s730_s23, 2 }
  0x11   : > { %s201_s9 = sand.u32 1, %s718_s20   ;;  %s544_s11 = sshll.u32 %s726_s22, 5 }
  0x12   : > { %s533_s10 = sshll.u32 %s201_s9, 5  ;;  %s212_s14 = scalar_lea.hbm %s913_s0, %s544_s11 }
  0x13   : > { %s205_s15 = scalar_lea.vmem [#allocation4], %s533_s10  ;;  %s213_s17 = sshll.u32 %s212_s14, 4  ;;  %s214_s17 = int_to_ptr.hbm [resolvable:$true] %s213_s17 }
  0x14   : > { %s215_s16 = sshll.u32 %s205_s15, 4  ;;  %p550_p0 = pnand %p557_p13, %p808_p4  ;;  %s216_s16 = int_to_ptr.vmem [resolvable:$true] %s215_s16 }
  0x15   : > { %p536_p1 = scmp.ge.s32.totalorder %s730_s23, 1  ;;  %s202_s24 = scalar_lea.sflag [#allocation5], %s201_s9 }
  0x16   : > { %s732_s25 = smov 256   ;;  %s733_s27 = smov 16  }
  0x17   : > { %552 = dma.hbm_to_vmem [thread:$0]  (!%p550_p0), %s214_s17, 512, %s216_s16, %s202_s24, %s732_s25, %s732_s25, %s733_s27  }
  0x18   : > { %p223_p2 = scmp.lt.s32.totalorder %s730_s23, 3 }
  0x1a   : > { %p224_p3 = pnand %p536_p1, %p223_p2 }
  0x1b   : > { %s841_s29 = sand.u32 (!%p224_p3), 1, %s714_s19  }
  0x1c   : > { %227 = sbr.rel (%p224_p3) target bundleno = 713 (0x2c9), region = 40  ;;  %s537_s10 = sshll.u32 (!%p224_p3), %s841_s29, 5 }
  0x1d   : > { %s230_s11 = scalar_lea.sflag (!%p224_p3), [#allocation5], %s841_s29  ;;  %s233_s12 = scalar_lea.vmem (!%p224_p3), [#allocation4], %s537_s10 }
  0x21   : > { %701 = dma.done.wait (%p814_p8), %s230_s11, 512  }
  0x22   : > { %703 = vsyncadd (%p814_p8), %s230_s11, 4294966784  ;;  %vm265_vm0 = vcmask 7168   ;;  %v734_v0 = vmov -inf   ;;  %v270_v1 = vld [vmem:[%s233_s12] sm:$0xff]  ;;  %v271_v2 = vld [vmem:[%s233_s12 + $0x8] sm:$0xff]  ;;  %v735_v9 = vmov 0.0  }
  0x23   : > { %268 = vst.msk [vmem:[#allocation3] sm:$0xff] %vm265_vm0, %v734_v0  ;;  %v289_v3 = vmax.f32 %v270_v1, %v271_v2  ;;  %v276_v4 = vadd.f32 %v271_v2, %v270_v1  ;;  %v272_v5 = vld [vmem:[%s233_s12 + $0x10] sm:$0xff]  ;;  %v273_v6 = vld [vmem:[%s233_s12 + $0x18] sm:$0xff]  ;;  %s736_s28 = smov 1   ;;  %v351_v24 = vld [vmem:[%s914_s1 + $0x8] sm:$0xff]  ;;  %vm356_vm1 = vcmask 130048   ;;  %s448_s12 = scalar_lea.hbm %s918_s5, %s722_s21 }
  0x24   : > { %269 = vst.msk [vmem:[#allocation3 + $0x8] sm:$0xff] %vm265_vm0, %v734_v0  ;;  %v292_v7 = vmax.f32 %v272_v5, %v273_v6  ;;  %v279_v8 = vadd.f32 %v273_v6, %v272_v5  ;;  %v350_v25 = vld [vmem:[%s914_s1] sm:$0xff]  ;;  %374 = vmatpush.msra.mxu0 %v351_v24  ;;  %vm390_vm2 = vcmask 1041408   ;;  %vm386_vm3 = vcmask 15360   ;;  %s452_s9 = sshll.u32 %s448_s12, 4  ;;  %s440_s21 = scalar_lea.sflag [#allocation6], %s841_s29  ;;  %s453_s9 = int_to_ptr.hbm [resolvable:$true] %s452_s9 }
  0x25   : > { %290 = vmax.xlane.f32.xlu0 %v289_v3  ;;  %277 = vadd.xlane.f32.xlu1 %v276_v4  ;;  %266 = vst.msk [vmem:[#allocation2] sm:$0xff] %vm265_vm0, %v735_v9  ;;  %v381_v35 = vld [vmem:[%s916_s3] sm:$0x3]  ;;  %vm437_vm7 = vcmask 122880   ;;  %s662_s13 = sshra.s32 %s453_s9, 4  ;;  %s668_s17 = scalar_lea.hbm %s918_s5, 2  ;;  %s663_s13 = int_to_ptr.hbm [resolvable:$true] %s662_s13 }
  0x26   : > { %267 = vst.msk [vmem:[#allocation2 + $0x8] sm:$0xff] %vm265_vm0, %v735_v9  ;;  %375 = vmatpush.msra.mxu0 %v350_v25  ;;  %539 = vmatpush.msk.msra.mxu1 %vm390_vm2, %v381_v35  ;;  %v612_v36 = vld [vmem:[%s915_s2] ss:$0 sm:$0xff]  ;;  %s664_s14 = scalar_lea.hbm %s663_s13, 1  ;;  %p669_p7 = scmp.lt.s32.totalorder %s663_s13, %s918_s5 }
  0x27   : > { %v613_v40 = vld [vmem:[%s917_s4] ss:$0 sm:$0xff]  ;;  %p665_p4 = scmp.ne.s32.totalorder %s663_s13, %s664_s14  ;;  %p670_p8 = scmp.lt.s32.totalorder %s668_s17, %s664_s14 }
  0x29   : > { %p666_p5 = pnand %p665_p4, %p818_p9  ;;  %p671_p10 = por %p670_p8, %p669_p7 }
  0x2a   : > { %v287_v10 = vld [vmem:[#allocation3] sm:$0xff] }
  0x2b   : > { %v288_v16 = vld [vmem:[#allocation3 + $0x8] sm:$0xff]  ;;  %p667_p6 = pneg %p666_p5 }
  0x2c   : > { %v274_v11 = vld [vmem:[#allocation2] sm:$0xff] }
  0x2d   : > { %293 = vmax.xlane.f32.xlu0 %v292_v7  ;;  %280 = vadd.xlane.f32.xlu1 %v279_v8  ;;  %v275_v17 = vld [vmem:[#allocation2 + $0x8] sm:$0xff]  ;;  %p672_p13 = pnand %p671_p10, %p667_p6 }
  0x98   : > { %v291_v12 = vpop.xlane.xlu0 %290  ;;  %v278_v13 = vpop.xlane.xlu1 %277 }
  0x99   : > { %v295_v14 = vmax.f32 %v287_v10, %v291_v12  ;;  %v282_v15 = vadd.f32 %v278_v13, %v274_v11 }
  0x9b   : > { %297 = vst.msk [vmem:[#allocation3] sm:$0xff] %vm265_vm0, %v295_v14 }
  0x9c   : > { %285 = vst.msk [vmem:[#allocation2] sm:$0xff] %vm265_vm0, %v282_v15 }
  0xa0   : > { %v294_v18 = vpop.xlane.xlu0 %293  ;;  %v281_v19 = vpop.xlane.xlu1 %280 }
  0xa1   : > { %v296_v20 = vmax.f32 %v288_v16, %v294_v18  ;;  %v283_v21 = vadd.f32 %v281_v19, %v275_v17 }
  0xa2   : > { %v306_v22 = vld [vmem:[#allocation3] sm:$0xff] }
  0xa3   : > { %298 = vst.msk [vmem:[#allocation3 + $0x8] sm:$0xff] %vm265_vm0, %v296_v20  ;;  %310 = vrot.lane.b32.xlu2 %v306_v22, %s736_s28  ;;  %v302_v26 = vld [vmem:[#allocation2] sm:$0xff] }
  0xa4   : > { %286 = vst.msk [vmem:[#allocation2 + $0x8] sm:$0xff] %vm265_vm0, %v283_v21  ;;  %v304_v27 = vmul.f32 0.00390625, %v302_v26 }
  0xaa   : > { %v307_v23 = vld [vmem:[#allocation3 + $0x8] sm:$0xff] }
  0xab   : > { %312 = vrot.lane.b32.xlu2 %v307_v23, %s736_s28  ;;  %v303_v30 = vld [vmem:[#allocation2 + $0x8] sm:$0xff]  ;;  %s259_s28 = scalar_lea.vmem [#allocation7], %s841_s29 }
  0xac   : > { %v305_v31 = vmul.f32 0.00390625, %v303_v30  ;;  %s450_s30 = sshll.u32 %s259_s28, 4  ;;  %s451_s30 = int_to_ptr.vmem [resolvable:$true] %s450_s30 }
  0xfd   : > { %v311_v28 = vpop.permute.xlu2 %310 }
  0xfe   : > { %v316_v29 = vsel %vm265_vm0, %v304_v27, %v311_v28 }
  0xff   : > { %318 = vxpose.xlu0.b32.start [1/2] (short) (narrow) %v316_v29, 8 }
 0x105   : > { %v313_v32 = vpop.permute.xlu2 %312 }
 0x106   : > { %v317_v33 = vsel %vm265_vm0, %v305_v31, %v313_v32 }
 0x107   : > { %319 = vxpose.xlu0.b32.end [2/2] (short) (narrow) %v317_v33, 8 }
 0x1a3   : > { %v334_v34 = vpop.trf.xlu0 }
 0x1a4   : > { %538 = vmatmul.msk.f32.vlgmr.msra.gmra.mxu0 %vm356_vm1, %v334_v34 }
 0x221   : > { %v377_v37 = vpop.f32.mrf.mxu0 }
 0x222   : > { %v378_v38 = vadd.f32 %v612_v36, %v377_v37 }
 0x224   : > { %v380_v39 = vmax.f32 %v378_v38, 0.0 }
 0x226   : > { %540 = vmatmul.msk.f32.vlgmr.msra.gmra.mxu1 %vm386_vm3, %v380_v39 }
 0x2a3   : > { %v411_v41 = vpop.f32.mrf.mxu1 }
 0x2a4   : > { %v412_v42 = vadd.f32 %v613_v40, %v411_v41 }
 0x2a6   : > { %v415_v43 = vrot.slane %v412_v42, 1 }
 0x2a8   : > { %v417_v44 = vadd.f32 %v415_v43, %v412_v42 }
 0x2aa   : > { %v541_v45 = vmul.f32 -1.442695, %v417_v44 }
 0x2ac   : > { %614 = vpow2.f32 %v541_v45 }
 0x2b2   : > { %v615_v46 = vpop.eup %614 }
 0x2b3   : > { %v421_v47 = vadd.f32 1.0, %v615_v46 }
 0x2b5   : > { %616 = vrcp.f32 %v421_v47  ;;  %v433_v51 = vand.u32 2147483648, %v421_v47  ;;  %v431_v53 = vand.u32 2147483647, %v421_v47  ;;  %vm427_vm5 = vweird.f32 %v421_v47 }
 0x2b7   : > { %v434_v55 = vor.u32 1.1754944e-38, %v433_v51  ;;  %vm432_vm8 = vcmp.eq.f32.partialorder %v431_v53, 8.507059e+37 }
 0x2bb   : > { %v617_v48 = vpop.eup %616 }
 0x2bc   : > { %v423_v49 = vmul.f32 %v617_v48, %v421_v47  ;;  %vm428_vm4 = vweird.f32 %v617_v48 }
 0x2bd   : > { %vm429_vm6 = vmor %vm427_vm5, %vm428_vm4 }
 0x2be   : > { %v424_v50 = vsub.f32 1.0, %v423_v49 }
 0x2c0   : > { %v425_v52 = vmul.f32 %v617_v48, %v424_v50 }
 0x2c2   : > { %v426_v54 = vadd.f32 %v617_v48, %v425_v52 }
 0x2c4   : > { %v430_v56 = vsel %vm429_vm6, %v617_v48, %v426_v54 }
 0x2c5   : > { %v435_v57 = vsel %vm432_vm8, %v434_v55, %v430_v56 }
 0x2c6   : > { %438 = vst.msk [vmem:[%s259_s28] sm:$0x1] %vm437_vm7, %v435_v57 }
 0x2c7   : > { %675 = shalt.err (!%p672_p13)
}
 0x2c8   : > { %547 = dma.vmem_to_hbm [thread:$0]  (%p818_p9), %s451_s30, 16, %s453_s9, %s440_s21  }
 0x2c9 PF: > { %s464_s29 = sand.u32 1, %s710_s18   ;;  %p554_p0 = pnand %p532_p12, %p825_p11 }
 0x2ca   : > { %s465_s27 = scalar_lea.sflag [#allocation6], %s464_s29 }
 0x2cb   : > { %p555_p1 = pneg %p554_p0 }
 0x2cd   : > { %705 = dma.done.wait (%p555_p1), %s465_s27, 16  }
 0x2ce   : > { %707 = vsyncadd (%p555_p1), %s465_s27, 4294967280  ;;  %s21_s23 = sadd.s32 1, %s730_s23   ;;  %s923_s18 = smov %s714_s19 }
 0x2cf   : > { %p18_p2 = scmp.ge.s32.totalorder %s21_s23, 4   ;;  %s924_s19 = smov %s718_s20 }
 0x2d0   : > { %s925_s20 = smov %s823_s7  ;;  %s926_s21 = smov %s726_s22 }
 0x2d1   : > { %s927_s22 = smov %s929_s26  ;;  %20 = sbr.rel (!%p18_p2) target bundleno = 6 (0x6), region = 93 }
 0x2d6   :  { %470 = vsyncpa [#allocation5], 1 }
 0x2d7   :  { %472 = vsyncpa [#allocation5 + $0x1], 1 }
 0x2d8   :  { %473 = vsyncpa [#allocation6], 1 }
 0x2d9   :  { %475 = vsyncpa [#allocation6 + $0x1], 1 }

</bundles_post_ra>
